<compile_context>
chip_gen: v7x
topology: tpu7x:2x2x1
jax: 0.10.0
libtpu: 0.0.40
codegen_flags: <defaults>
</compile_context>

<pallas_src>
import jax
import jax.numpy as jnp
from jax.experimental import pallas as pl
from jax.experimental.pallas import tpu as pltpu

_LANE = 128


def _int_pow(x, n):
    """x ** n for a static positive integer n via repeated multiplies (VPU only)."""
    assert n >= 1
    result = None
    base = x
    while n:
        if n & 1:
            result = base if result is None else result * base
        n >>= 1
        if n:
            base = base * base
    return result


def _pow_clamped_static(x, p_val, eps):
    """clamp(x, eps) ** p for a compile-time p.  Integer p -> VPU multiplies."""
    xc = jnp.maximum(x, eps)
    if float(p_val).is_integer() and float(p_val) >= 1.0:
        return _int_pow(xc, int(p_val))
    return jnp.exp(p_val * jnp.log(xc))


def _make_gem_kernel(hw, eps, p_static):
    """Builds the GeM kernel.  p_static is a Python float (baked in) or None
    (p arrives as a traced (1,) f32 array in SMEM)."""
    inv_hw = 1.0 / float(hw)

    if p_static is not None:
        p_val = float(p_static)

        def kernel(x_ref, o_ref):
            # x_ref: VMEM (1, c_tile, HW) input dtype; o_ref: VMEM (1, 1, c_tile)
            x = x_ref[...].astype(jnp.float32)
            xp = _pow_clamped_static(x, p_val, eps)
            mean = jnp.sum(xp, axis=-1) * inv_hw          # (1, c_tile), > 0
            y = jnp.exp(jnp.log(mean) * (1.0 / p_val))    # mean ** (1/p)
            o_ref[0] = y.astype(o_ref.dtype)

        return kernel

    def kernel(p_ref, x_ref, o_ref):
        # p_ref: SMEM (1,) f32 learnable exponent
        p = p_ref[0]
        x = x_ref[...].astype(jnp.float32)
        xp = jnp.exp(p * jnp.log(jnp.maximum(x, eps)))    # clamp(x,eps)**p
        mean = jnp.sum(xp, axis=-1) * inv_hw              # (1, c_tile), > 0
        y = jnp.exp(jnp.log(mean) / p)                    # mean ** (1/p)
        o_ref[0] = y.astype(o_ref.dtype)

    return kernel


def gem_pallas(x, p=3.0, eps=1e-6, flatten=True, c_tile=None,
               block_budget_bytes=8 * 1024 * 1024):
    """GeM pooling. x: (N, C, H, W); p: Python scalar or shape-(1,) array.

    Returns (N, C) if flatten else (N, C, 1, 1), matching the PyTorch module.
    """
    n, c, h, w = x.shape
    hw = h * w
    x3 = x.reshape(n, c, hw)                       # free reshape, no HBM pass

    p_static = float(p) if isinstance(p, (int, float)) else None

    # ---- channel-tile selection (budget against the f32 working set) -------
    lanepad_hw = -(-hw // _LANE) * _LANE
    itemsize = x.dtype.itemsize
    # double-buffered wire block + f32 cast + pow intermediate, per channel
    per_channel = lanepad_hw * (2 * itemsize + 2 * 4)
    if c_tile is None:
        c_tile = block_budget_bytes // per_channel
    c_tile = int(c_tile)
    if c_tile >= c:
        c_tile = c                                  # full extent: always legal
    else:
        c_tile = max(8, (c_tile // 8) * 8)          # (8, 128) sublane rule
        if c_tile >= c:
            c_tile = c
    num_c = -(-c // c_tile)

    # ---- VMEM limit sized from the actual need -----------------------------
    block_wire = c_tile * hw * itemsize
    block_f32 = c_tile * lanepad_hw * 4
    vmem_need = 2 * block_wire + 2 * block_f32 + (2 << 20)
    vmem_limit = int(min(112 << 20, max(32 << 20, 2 * vmem_need)))

    kernel = _make_gem_kernel(hw, float(eps), p_static)

    x_spec = pl.BlockSpec((1, c_tile, hw), lambda ni, ci: (ni, ci, 0))
    out_spec = pl.BlockSpec((1, 1, c_tile), lambda ni, ci: (ni, 0, ci))

    if p_static is None:
        p_arr = jnp.asarray(p, jnp.float32).reshape(1)
        in_specs = [pl.BlockSpec(memory_space=pltpu.MemorySpace.SMEM), x_spec]
        args = (p_arr, x3)
    else:
        in_specs = [x_spec]
        args = (x3,)

    out = pl.pallas_call(
        kernel,
        out_shape=jax.ShapeDtypeStruct((n, 1, c), x.dtype),
        grid_spec=pltpu.PrefetchScalarGridSpec(
            num_scalar_prefetch=0,
            grid=(n, num_c),
            in_specs=in_specs,
            out_specs=out_spec,
        ),
        compiler_params=pltpu.CompilerParams(
            dimension_semantics=("parallel", "parallel"),
            vmem_limit_bytes=vmem_limit,
        ),
    )(*args)

    out = out.reshape(n, c)
    return out if flatten else out.reshape(n, c, 1, 1)


def _reference(x, p, eps=1e-6):
    # Pure-JAX reference matching F.avg_pool2d(clamp(x,eps)**p, (H,W))**(1/p).
    pv = jnp.asarray(p, jnp.float32).reshape(())
    xp = jnp.power(jnp.maximum(x.astype(jnp.float32), eps), pv)
    mean = jnp.mean(xp, axis=(2, 3))
    return jnp.power(mean, 1.0 / pv)               # (N, C)  (flatten=True)


if __name__ == "__main__":
    key = jax.random.PRNGKey(0)
    k1, k2 = jax.random.split(key)

    # Case 1: module default p=3 (static-integer fast path, no EUP pow).
    x1 = jax.random.normal(k1, (2, 4, 16, 16), dtype=jnp.float32)
    out1 = jax.block_until_ready(gem_pallas(x1, 3.0))
    ref1 = _reference(x1, 3.0)
    assert out1.shape == (2, 4)
    assert jnp.allclose(out1, ref1, atol=1e-5, rtol=1e-4), "mismatch vs ref (case 1)"

    # Case 2: learnable (traced) p via SMEM; ragged H*W = 1089 (not a lane
    # multiple) exercises the unpadded, mask-free reduce path.
    x2 = jax.random.normal(k2, (2, 4, 33, 33), dtype=jnp.float32)
    p2 = jnp.asarray([2.5], dtype=jnp.float32)
    out2 = jax.block_until_ready(gem_pallas(x2, p2))
    ref2 = _reference(x2, 2.5)
    assert out2.shape == (2, 4)
    assert jnp.allclose(out2, ref2, atol=1e-5, rtol=1e-4), "mismatch vs ref (case 2)"

    # Case 3: flatten=False keeps the (N, C, 1, 1) shape of the module.
    out3 = jax.block_until_ready(gem_pallas(x1, 3.0, flatten=False))
    assert out3.shape == (2, 4, 1, 1)
    assert jnp.allclose(out3.reshape(2, 4), ref1, atol=1e-5, rtol=1e-4), \
        "mismatch vs ref (case 3)"

    print("KERNEL_OK")
</pallas_src>

<mosaic_0001>
module attributes {stable_mosaic.version = 11 : i64} {
  func.func @kernel(%arg0: i32, %arg1: i32, %arg2: memref<1x4x256xf32, #tpu.memory_space<vmem>>, %arg3: memref<1x1x4xf32, #tpu.memory_space<vmem>>) attributes {dimension_semantics = [#tpu.dimension_semantics<parallel>, #tpu.dimension_semantics<parallel>], iteration_bounds = array<i64: 2, 1>, scalar_prefetch = 0 : i64, scratch_operands = 0 : i64, tpu.core_type = #tpu.core_type<tc>, window_params = [{transform_indices = @transform_0, window_bounds = array<i64: 1, 4, 256>}, {transform_indices = @transform_1, window_bounds = array<i64: 1, 1, 4>}]} {
    %c0 = arith.constant 0 : index
    %c0_0 = arith.constant 0 : index
    %c0_1 = arith.constant 0 : index
    %0 = vector.load %arg2[%c0, %c0_0, %c0_1] : memref<1x4x256xf32, #tpu.memory_space<vmem>>, vector<1x4x256xf32>
    %cst = arith.constant 9.99999997E-7 : f32
    %1 = vector.broadcast %cst : f32 to vector<1x4x256xf32>
    %2 = arith.maximumf %0, %1 : vector<1x4x256xf32>
    %3 = arith.mulf %2, %2 : vector<1x4x256xf32>
    %4 = arith.mulf %2, %3 : vector<1x4x256xf32>
    %cst_2 = arith.constant dense<0.000000e+00> : vector<1x4xf32>
    %5 = vector.multi_reduction <add>, %4, %cst_2 [2] : vector<1x4x256xf32> to vector<1x4xf32>
    %cst_3 = arith.constant 3.906250e-03 : f32
    %6 = vector.broadcast %cst_3 : f32 to vector<1x4xf32>
    %7 = arith.mulf %5, %6 : vector<1x4xf32>
    %8 = math.log %7 : vector<1x4xf32>
    %cst_4 = arith.constant 0.333333343 : f32
    %9 = vector.broadcast %cst_4 : f32 to vector<1x4xf32>
    %10 = arith.mulf %8, %9 : vector<1x4xf32>
    %11 = math.exp %10 : vector<1x4xf32>
    %c0_5 = arith.constant 0 : index
    %c0_6 = arith.constant 0 : index
    %c0_7 = arith.constant 0 : index
    %12 = vector.load %arg3[%c0_5, %c0_6, %c0_7] : memref<1x1x4xf32, #tpu.memory_space<vmem>>, vector<1x1x4xf32>
    %13 = vector.shape_cast %12 : vector<1x1x4xf32> to vector<1x4xf32>
    %14 = vector.shape_cast %11 : vector<1x4xf32> to vector<1x1x4xf32>
    tpu.vector_store %arg3[%c0_5, %c0_6, %c0_7], %14 {strides = array<i32>} : memref<1x1x4xf32, #tpu.memory_space<vmem>>, vector<1x1x4xf32>,
    return
  }
  func.func @transform_0(%arg0: i32, %arg1: i32) -> (i32, i32, i32) {
    %c0_i32 = arith.constant 0 : i32
    %c0_i32_0 = arith.constant 0 : i32
    return %arg0, %arg1, %c0_i32 : i32, i32, i32
  }
  func.func @transform_1(%arg0: i32, %arg1: i32) -> (i32, i32, i32) {
    %c0_i32 = arith.constant 0 : i32
    %c0_i32_0 = arith.constant 0 : i32
    return %arg0, %c0_i32, %arg1 : i32, i32, i32
  }
}

</mosaic_0001>

<bundles_post_ra>
// kernel: tpu_custom_call.1
= control target key start
LH: loop header
LB: loop body
LE: loop exit
PB: predicated region body
PF: predicated region fallthrough
CT: control target
= control target key end

     0   :  { %6 = vsyncpa [#allocation3], 0  ;;  %s649_s0 = inlined_call_operand.hbm [shape: f32[2,4,256], index: 0, kind: input, shape index: {}]   ;;  %s650_s1 = inlined_call_operand.hbm [shape: f32[2,1,4], index: 1, kind: output, shape index: {}]  }
   0x1   :  { %8 = vsyncpa [#allocation3 + $0x1], 0 }
   0x2   :  { %9 = vsyncpa [#allocation4], 0 }
   0x3   :  { %11 = vsyncpa [#allocation4 + $0x1], 0  ;;  %s476_s6 = smov 0   ;;  %s478_s7 = smov 0  }
   0x4   :  { %s480_s8 = smov 0   ;;  %s482_s9 = smov 0  }
   0x5   :  { %s484_s10 = smov 0   ;;  %s486_s11 = smov 0  }
   0x6 LB: > { %s271_s12 = sadd.s32 4294967295, %s462_s11   ;;  %s272_s13 = sadd.s32 4294967294, %s462_s11   ;;  %s462_s11 = sphi %s486_s11, %s17_s11   ;;  %s458_s10 = sphi %s484_s10, %s666_s10   ;;  %s454_s9 = sphi %s482_s9, %s665_s9   ;;  %s450_s8 = sphi %s480_s8, %s664_s8   ;;  %s446_s7 = sphi %s478_s7, %s663_s7   ;;  %s442_s6 = sphi %s476_s6, %s662_s6  }
   0x7   : > { %s29_s14 = sadd.s32 1, %s458_s10  ;;  %s38_s15 = sadd.s32 1, %s450_s8 }
   0x8   : > { %p31_p0 = scmp.ge.s32.totalorder %s29_s14, 2  ;;  %p45_p1 = scmp.ne.s32.totalorder %s450_s8, %s446_s7 }
   0x9   : > { %p46_p2 = scmp.eq.s32.totalorder %s462_s11, 0  ;;  %p51_p3 = scmp.ne.s32.totalorder %s446_s7, %s442_s6 }
   0xa   : > { %s668_s14 = smov (%p31_p0, %s29_s14), 0  ;;  %p52_p5 = scmp.eq.s32.totalorder %s271_s12, 0 }
   0xb   : > { %p517_p4 = por %p46_p2, %p45_p1  ;;  %s33_s17 = ssub.s32 %s458_s10, %s668_s14 }
   0xc   : > { %p77_p6 = scmp.eq.s32.totalorder %s271_s12, 1  ;;  %p36_p7 = scmp.eq.s32.totalorder %s33_s17, 0 }
   0xd   : > { %p523_p8 = por %p52_p5, %p51_p3  ;;  %p83_p10 = scmp.eq.s32.totalorder %s272_s13, 1 }
   0xe   : > { %p527_p9 = por %p77_p6, %p45_p1  ;;  %p296_p13 = scmp.lt.s32.totalorder %s462_s11, 2 }
   0xf   : > { %s532_s20 = scalar_select %p36_p7, %s450_s8, %s38_s15  }
  0x10   : > { %s654_s19 = scalar_select %p527_p9, 1, 0 }
  0x11   : > { %p534_p11 = por %p83_p10, %p51_p3  ;;  %s103_s22 = sand.u32 1, %s450_s8  }
  0x12   : > { %s275_s23 = sshll.u32 %s103_s22, 3  ;;  %s283_s24 = sshll.u32 %s458_s10, 7 }
  0x13   : > { %s655_s21 = scalar_select %p534_p11, 1, 0 }
  0x14   : > { %s545_s27 = scalar_lea.hbm %s649_s0, %s283_s24  ;;  %s107_s28 = scalar_lea.vmem [#allocation2], %s275_s23 }
  0x15   : > { %s117_s29 = sshll.u32 %s107_s28, 4  ;;  %p551_p0 = pnand %p296_p13, %p517_p4  ;;  %s547_s29 = int_to_ptr.vmem [resolvable:$true] %s117_s29 }
  0x16   : > { %s104_s2 = scalar_lea.sflag [#allocation3], %s103_s22  ;;  %s350_s3 = scalar_lea.hbm %s545_s27, 128 }
  0x17   : > { %p351_p3 = scmp.ne.s32.totalorder %s545_s27, %s350_s3  ;;  %p352_p5 = pneg %p551_p0 }
  0x18   : > { %s355_s12 = scalar_lea.hbm %s649_s0, 256  ;;  %p356_p4 = scmp.lt.u32.totalorder %s545_s27, %s649_s0 }
  0x19   : > { %p353_p6 = pnand %p352_p5, %p351_p3  ;;  %p357_p10 = scmp.lt.u32.totalorder %s355_s12, %s350_s3 }
  0x1a   : > { %p359_p12 = scmp.lt.u32.totalorder %s350_s3, %s545_s27 }
  0x1b   : > { %p354_p7 = pneg %p353_p6  ;;  %p358_p13 = por %p357_p10, %p356_p4 }
  0x1d   : > { %p360_p1 = por %p359_p12, %p358_p13 }
  0x1f   : > { %p361_p2 = pnand %p360_p1, %p354_p7 }
  0x21   : > { %364 = shalt.err (!%p361_p2)
}
  0x22   : > { %s365_s16 = scalar_lea.vmem %s547_s29, 128  ;;  %s464_s17 = smov [#allocation2]  }
  0x23   : > { %p366_p3 = scmp.ne.s32.totalorder %s547_s29, %s365_s16  ;;  %s370_s22 = sshll.u32 %s464_s17, 4  ;;  %s371_s22 = int_to_ptr.vmem [resolvable:$false] %s370_s22 }
  0x24   : > { %s372_s23 = scalar_lea.vmem %s371_s22, 256  ;;  %p373_p9 = scmp.lt.s32.totalorder %s547_s29, %s371_s22 }
  0x25   : > { %p368_p6 = pnand %p366_p3, %p352_p5  ;;  %p374_p4 = scmp.lt.s32.totalorder %s372_s23, %s365_s16 }
  0x27   : > { %p369_p11 = pneg %p368_p6  ;;  %p375_p10 = por %p374_p4, %p373_p9 }
  0x29   : > { %p376_p12 = pnand %p375_p10, %p369_p11 }
  0x2b   : > { %379 = shalt.err (!%p376_p12)
}
  0x2c   : > { %291 = dma.hbm_to_vmem [thread:$0]  (!%p551_p0), %s545_s27, 128, %s547_s29, %s104_s2  }
  0x2d   : > { %p657_p1 = scmp.lt.s32.totalorder %s462_s11, 3  ;;  %p658_p2 = scmp.ge.s32.totalorder %s462_s11, 1 }
  0x2f   : > { %p123_p5 = pnand %p658_p2, %p657_p1 }
  0x30   : > { %s587_s24 = sand.u32 (!%p123_p5), 1, %s446_s7  }
  0x31   : > { %126 = sbr.rel (%p123_p5) target bundleno = 257 (0x101), region = 24  ;;  %s279_s25 = sshll.u32 (!%p123_p5), %s587_s24, 3 }
  0x32   : > { %s129_s26 = scalar_lea.sflag (!%p123_p5), [#allocation3], %s587_s24  ;;  %s132_s28 = scalar_lea.vmem (!%p123_p5), [#allocation2], %s279_s25 }
  0x38   : > { %433 = dma.done.wait (%p523_p8), %s129_s26, 128  }
  0x39   : > { %435 = vsyncadd (%p523_p8), %s129_s26, 4294967168  ;;  %v150_v0 = vld [vmem:[%s132_s28] sm:$0xff]  ;;  %vm157_vm0 = vcmask 1043456   ;;  %v170_v14 = vlaneseq  ;;  %s280_s18 = sshll.u32 %s454_s9, 4  ;;  %s149_s27 = scalar_lea.vmem [#allocation5], %s587_s24  ;;  %vm177_vm1 = vcmask 24576  }
  0x3a   : > { %v151_v1 = vmax.f32 %v150_v0, 1e-06  ;;  %s193_s29 = sshll.u32 %s149_s27, 4  ;;  %s600_s3 = scalar_lea.hbm %s650_s1, %s280_s18  ;;  %s602_s29 = int_to_ptr.vmem [resolvable:$true] %s193_s29 }
  0x3b   : > { %v171_v15 = vand.u32 127, %v170_v14  ;;  %v173_v16 = vshrl.u32 %v170_v14, 7  ;;  %s180_s4 = scalar_lea.sflag [#allocation4], %s587_s24  ;;  %s380_s5 = scalar_lea.vmem %s602_s29, 16 }
  0x3c   : > { %v152_v2 = vmul.f32 %v151_v1, %v151_v1  ;;  %p381_p8 = scmp.ne.s32.totalorder %s602_s29, %s380_s5  ;;  %p659_p9 = scmp.ne.s32.totalorder %s654_s19, 0 }
  0x3d   : > { %v174_v17 = vsub.s32 %v171_v15, %v173_v16  ;;  %s465_s9 = smov [#allocation5]  }
  0x3e   : > { %v153_v3 = vmul.f32 %v152_v2, %v151_v1  ;;  %p382_p11 = pnand %p381_p8, %p659_p9  ;;  %s384_s12 = sshll.u32 %s465_s9, 4  ;;  %s385_s12 = int_to_ptr.vmem [resolvable:$false] %s384_s12 }
  0x3f   : > { %s386_s13 = scalar_lea.vmem %s385_s12, 32  ;;  %p387_p7 = scmp.lt.s32.totalorder %s602_s29, %s385_s12 }
  0x40   : > { %v155_v4 = vcombine.high %v153_v3, %v153_v3  ;;  %v158_v5 = vsel %vm157_vm0, %v153_v3, 0.0  ;;  %p383_p0 = pneg %p382_p11  ;;  %p388_p13 = scmp.lt.s32.totalorder %s386_s13, %s380_s5 }
  0x42   : > { %v159_v6 = vsel %vm157_vm0, %v155_v4, 0.0  ;;  %p389_p3 = por %p388_p13, %p387_p7 }
  0x43   : > { %v160_v7 = vadd.f32 %v159_v6, %v158_v5 }
  0x44   : > { %p390_p6 = pnand %p389_p3, %p383_p0 }
  0x45   : > { %161 = vadd.xlane.f32.xlu0 %v160_v7 }
  0xd2   : > { %v162_v8 = vpop.xlane.xlu0 %161 }
  0xd3   : > { %v163_v9 = vmul.f32 0.00390625, %v162_v8 }
  0xd5   : > { %346 = vlog2.f32 %v163_v9 }
  0xdf   : > { %v347_v10 = vpop.eup %346 }
  0xe0   : > { %v165_v11 = vmul.f32 0.6931472, %v347_v10 }
  0xe2   : > { %v166_v12 = vmul.f32 0.33333334, %v165_v11 }
  0xe4   : > { %v167_v13 = vmul.f32 1.442695, %v166_v12 }
  0xe6   : > { %348 = vpow2.f32 %v167_v13 }
  0xf0   : > { %v349_v18 = vpop.eup %348 }
  0xf1   : > { %v175_v19 = vrot.slane %v349_v18, %v174_v17 }
  0xf3   : > { %178 = vst.msk [vmem:[%s149_s27] sm:$0x1] %vm177_vm1, %v175_v19 }
  0xf4   : > { %393 = shalt.err (!%p390_p6)
}
  0xf5   : > { %s394_s15 = scalar_lea.hbm %s600_s3, 16  ;;  %s398_s22 = scalar_lea.hbm %s650_s1, 32 }
  0xf6   : > { %p395_p4 = scmp.ne.s32.totalorder %s600_s3, %s394_s15  ;;  %p399_p1 = scmp.lt.u32.totalorder %s600_s3, %s650_s1 }
  0xf7   : > { %p400_p2 = scmp.lt.u32.totalorder %s398_s22, %s394_s15  ;;  %p402_p8 = scmp.lt.u32.totalorder %s394_s15, %s600_s3 }
  0xf8   : > { %p396_p10 = pnand %p395_p4, %p659_p9 }
  0xf9   : > { %p401_p5 = por %p400_p2, %p399_p1 }
  0xfa   : > { %p397_p12 = pneg %p396_p10 }
  0xfb   : > { %p403_p11 = por %p402_p8, %p401_p5 }
  0xfd   : > { %p404_p0 = pnand %p403_p11, %p397_p12 }
  0xff   : > { %407 = shalt.err (!%p404_p0)
}
 0x100   : > { %286 = dma.vmem_to_hbm [thread:$0]  (%p659_p9), %s602_s29, 16, %s600_s3, %s180_s4  }
 0x101 PF: > { %s205_s25 = sand.u32 1, %s442_s6   ;;  %p660_p7 = scmp.ne.s32.totalorder %s655_s21, 0 }
 0x102   : > { %p661_p13 = scmp.ge.s32.totalorder %s462_s11, 2  ;;  %s206_s26 = scalar_lea.sflag [#allocation4], %s205_s25 }
 0x104   : > { %p293_p3 = pnand %p661_p13, %p660_p7 }
 0x106   : > { %437 = dma.done.wait (!%p293_p3), %s206_s26, 16  }
 0x107   : > { %439 = vsyncadd (!%p293_p3), %s206_s26, 4294967280  ;;  %s17_s11 = sadd.s32 1, %s462_s11   ;;  %s662_s6 = smov %s446_s7 }
 0x108   : > { %p14_p6 = scmp.ge.s32.totalorder %s17_s11, 4   ;;  %s663_s7 = smov %s450_s8 }
 0x109   : > { %s664_s8 = smov %s532_s20  ;;  %s665_s9 = smov %s458_s10 }
 0x10a   : > { %s666_s10 = smov %s668_s14  ;;  %16 = sbr.rel (!%p14_p6) target bundleno = 6 (0x6), region = 69 }
 0x111   :  { %210 = vsyncpa [#allocation3], 1 }
 0x112   :  { %212 = vsyncpa [#allocation3 + $0x1], 1 }
 0x113   :  { %213 = vsyncpa [#allocation4], 1 }
 0x114   :  { %215 = vsyncpa [#allocation4 + $0x1], 1 }

</bundles_post_ra>
